<compile_context>
chip_gen: v7x
topology: tpu7x:2x2x1
jax: 0.10.0
libtpu: 0.0.40
codegen_flags: <defaults>
</compile_context>

<pallas_src>
import functools

import numpy as np
import jax
import jax.numpy as jnp
from jax.experimental import pallas as pl
from jax.experimental.pallas import tpu as pltpu


def _round_up(a, b):
    return (a + b - 1) // b * b


def _sublane(itemsize):
    # Sublane packing: 8 rows for 4-byte dtypes, 16 for 2-byte, 32 for 1-byte.
    return max(8, 32 // max(1, itemsize))


def _divisors(n):
    out, i = set(), 1
    while i * i <= n:
        if n % i == 0:
            out.add(i)
            out.add(n // i)
        i += 1
    return sorted(out)


def _choose_fold(R, W, s, max_k=512):
    """Pick g | R so the folded output width g*s*W*s is a multiple of 128
    (full-lane, unmasked stores) while the matmul contraction g*W stays small."""
    out_unit = W * s * s
    cands = [g for g in _divisors(R) if g * W <= max_k]
    if not cands:
        return 1
    aligned = [g for g in cands if (g * out_unit) % 128 == 0]
    if aligned:
        return min(aligned)          # smallest aligned fold = least MXU work
    dense = [g for g in cands if g * out_unit >= 256]
    if dense:
        return min(dense)            # mostly-unmasked stores as a fallback
    return max(cands)


def _choose_row_block(Rf, out_row_bytes, sublane, target_bytes=8 << 20, min_steps=4):
    """Rows per grid step: a divisor of Rf (no ragged last block), a multiple of
    the sublane packing (no padded/masked tiles), output tile <= ~target_bytes,
    and >= min_steps (preferably an even number of) grid steps so the v7x
    megacore split is balanced and the pipeline reaches steady state."""
    divs = _divisors(Rf)
    cands = [d for d in divs if d % sublane == 0 or d == Rf]
    fitting = [d for d in cands if d * out_row_bytes <= target_bytes]
    if not fitting:
        return min(cands)
    pref = [d for d in fitting if Rf // d >= min_steps]
    pref_even = [d for d in pref if (Rf // d) % 2 == 0]
    if pref_even:
        return max(pref_even)
    if pref:
        return max(pref)
    return max(fitting)


@functools.lru_cache(maxsize=None)
def _replication_matrix_f32(W, s, g):
    """Block-diagonal 0/1 matrix mapping a folded input row (g*W lanes, layout
    (r, w)) to the folded upsampled row (g*s*W*s lanes, layout (r, j, w, k))."""
    lo = np.arange(g * s * W * s)
    r = lo // (s * W * s)
    w = (lo % (W * s)) // s
    src = r * W + w
    return (src[None, :] == np.arange(g * W)[:, None]).astype(np.float32)


def _upsample_matmul_kernel(x_ref, m_ref, o_ref, *, precision):
    # One MXU matmul performs the W interleave, the H replication and the row
    # fold in a single lane-dense (multiple-of-128 wide) output tile; the MXU is
    # otherwise idle in this bandwidth-bound op.
    o_ref[...] = jnp.dot(
        x_ref[...],
        m_ref[...],
        preferred_element_type=jnp.float32,
        precision=precision,
    ).astype(o_ref.dtype)


def upsample_nearest(x, scale_factor):
    """Equivalent of F.interpolate(x, scale_factor=s, mode='nearest') for an NCHW
    input with an integer scale factor (the only configuration YOLOv3 uses)."""
    s = int(scale_factor)
    if s != scale_factor or s < 1:
        # TODO(synk): non-integer scale factors are not implemented.
        raise NotImplementedError("only integer scale factors are supported")
    if s == 1:
        return x

    N, C, H, W = x.shape

    if x.dtype == jnp.float32:
        precision = jax.lax.Precision.HIGHEST    # 6-pass: exact for finite normals
    elif x.dtype == jnp.bfloat16:
        precision = jax.lax.Precision.DEFAULT    # single pass already exact for 0/1 M
    else:
        # TODO(synk): non-f32/bf16 dtypes take the plain-XLA path; the MXU
        # replication matrix is only exact for f32 / bf16 activations.
        return jnp.repeat(jnp.repeat(x, s, axis=2), s, axis=3)

    R = N * C * H
    isz = jnp.dtype(x.dtype).itemsize
    sub = _sublane(isz)

    g = _choose_fold(R, W, s)
    Rf = R // g
    k_in = g * W                     # matmul contraction dim (folded input row)
    width = g * s * W * s            # folded output row; multiple of 128 if possible

    tr = _choose_row_block(Rf, width * isz, sub)
    grid = (Rf // tr,)

    x2f = x.reshape(Rf, k_in)        # pure view of the NCHW input
    m = jnp.asarray(_replication_matrix_f32(W, s, g), dtype=x.dtype)

    # Honest (lane/sublane-padded), double-buffered VMEM budget.
    in_tile = _round_up(tr, sub) * _round_up(k_in, 128) * isz
    out_tile = _round_up(tr, sub) * _round_up(width, 128) * isz
    m_bytes = _round_up(k_in, sub) * _round_up(width, 128) * isz
    vmem_need = 2 * (in_tile + out_tile) + 2 * m_bytes + (2 << 20)
    vmem_limit = int(min(max(vmem_need, 32 << 20), 64 << 20))

    cost = pl.CostEstimate(
        flops=2 * Rf * k_in * width,
        transcendentals=0,
        bytes_accessed=(R * W + R * s * W * s + k_in * width) * isz,
    )

    out2d = pl.pallas_call(
        functools.partial(_upsample_matmul_kernel, precision=precision),
        out_shape=jax.ShapeDtypeStruct((Rf, width), x.dtype),
        grid=grid,
        in_specs=[
            pl.BlockSpec((tr, k_in), lambda i: (i, 0)),
            # Constant block index: M is fetched once and never re-DMAed.
            pl.BlockSpec((k_in, width), lambda i: (0, 0)),
        ],
        out_specs=pl.BlockSpec((tr, width), lambda i: (i, 0)),
        compiler_params=pltpu.CompilerParams(
            dimension_semantics=("parallel",),
            vmem_limit_bytes=vmem_limit,
        ),
        cost_estimate=cost,
    )(x2f, m)

    # (Rf, g*s*W*s) row-major == (N, C, H*s, W*s): a pure view, no data movement.
    return out2d.reshape(N, C, H * s, W * s)


class Upsample:
    """Mirror of the PyTorch module: stores scale_factor / mode, forwards to the
    Pallas nearest-neighbour kernel."""

    def __init__(self, scale_factor, mode="nearest"):
        if mode != "nearest":
            # TODO(synk): only 'nearest' (YOLOv3's configuration) is implemented.
            raise NotImplementedError("only mode='nearest' is supported")
        self.scale_factor = scale_factor
        self.mode = mode

    def __call__(self, x):
        return upsample_nearest(x, self.scale_factor)


if __name__ == "__main__":
    scale_factor = 2
    mode = "nearest"

    key = jax.random.PRNGKey(0)
    x = jax.random.normal(key, (2, 4, 16, 16), dtype=jnp.float32)

    up = Upsample(scale_factor, mode)
    y = jax.block_until_ready(up(x))

    # Reference: same semantics as F.interpolate(..., mode='nearest') with an
    # integer scale factor.
    ref = jnp.repeat(jnp.repeat(x, scale_factor, axis=2), scale_factor, axis=3)
    assert y.shape == (2, 4, 32, 32), y.shape
    assert bool(jnp.allclose(y, ref, rtol=1e-6, atol=1e-6)), (
        "mismatch vs nearest-neighbour reference"
    )

    print("KERNEL_OK")
</pallas_src>

<mosaic_0001>
module attributes {stable_mosaic.version = 11 : i64} {
  func.func @_upsample_matmul_kernel(%arg0: i32, %arg1: memref<16x32xf32, #tpu.memory_space<vmem>>, %arg2: memref<32x128xf32, #tpu.memory_space<vmem>>, %arg3: memref<16x128xf32, #tpu.memory_space<vmem>>) attributes {dimension_semantics = [#tpu.dimension_semantics<parallel>], iteration_bounds = array<i64: 4>, scalar_prefetch = 0 : i64, scratch_operands = 0 : i64, tpu.core_type = #tpu.core_type<tc>, window_params = [{transform_indices = @transform_0, window_bounds = array<i64: 16, 32>}, {pipeline_mode = #tpu.pipeline_mode<synchronous>, transform_indices = @transform_1, window_bounds = array<i64: 32, 128>}, {transform_indices = @transform_2, window_bounds = array<i64: 16, 128>}]} {
    %c0 = arith.constant 0 : index
    %c0_0 = arith.constant 0 : index
    %0 = vector.load %arg1[%c0, %c0_0] : memref<16x32xf32, #tpu.memory_space<vmem>>, vector<16x32xf32>
    %c0_1 = arith.constant 0 : index
    %c0_2 = arith.constant 0 : index
    %1 = vector.load %arg2[%c0_1, %c0_2] : memref<32x128xf32, #tpu.memory_space<vmem>>, vector<32x128xf32>
    %cst = arith.constant dense<0.000000e+00> : vector<16x128xf32>
    %2 = tpu.matmul %0, %1, %cst {dimension_numbers = #tpu.dot_dimension_numbers<[1], [0], [0], [1], [0, 0, 1, 1], [], []>, precision = #tpu.contract_precision<fp32>} : vector<16x32xf32>, vector<32x128xf32>, vector<16x128xf32> -> vector<16x128xf32>
    %c0_3 = arith.constant 0 : index
    %c0_4 = arith.constant 0 : index
    %3 = vector.load %arg3[%c0_3, %c0_4] : memref<16x128xf32, #tpu.memory_space<vmem>>, vector<16x128xf32>
    tpu.vector_store %arg3[%c0_3, %c0_4], %2 {strides = array<i32>} : memref<16x128xf32, #tpu.memory_space<vmem>>, vector<16x128xf32>,
    return
  }
  func.func @transform_0(%arg0: i32) -> (i32, i32) {
    %c0_i32 = arith.constant 0 : i32
    %c0_i32_0 = arith.constant 0 : i32
    return %arg0, %c0_i32 : i32, i32
  }
  func.func @transform_1(%arg0: i32) -> (i32, i32) {
    %c0_i32 = arith.constant 0 : i32
    %c0_i32_0 = arith.constant 0 : i32
    %c0_i32_1 = arith.constant 0 : i32
    return %c0_i32, %c0_i32_0 : i32, i32
  }
  func.func @transform_2(%arg0: i32) -> (i32, i32) {
    %c0_i32 = arith.constant 0 : i32
    %c0_i32_0 = arith.constant 0 : i32
    return %arg0, %c0_i32 : i32, i32
  }
}

</mosaic_0001>

<bundles_post_ra>
// kernel: tpu_custom_call.1
= control target key start
LH: loop header
LB: loop body
LE: loop exit
PB: predicated region body
PF: predicated region fallthrough
CT: control target
= control target key end

     0   :  { %7 = vsyncpa [#allocation3], 0  ;;  %s1197_s0 = inlined_call_operand.vmem [shape: f32[64,32], index: 0, kind: input, shape index: {}]   ;;  %s1198_s1 = inlined_call_operand.vmem [shape: f32[32,128], index: 1, kind: input, shape index: {}]   ;;  %s1199_s2 = inlined_call_operand.hbm [shape: f32[64,128], index: 2, kind: output, shape index: {}]  }
   0x1   :  { %9 = vsyncpa [#allocation3 + $0x1], 0  ;;  %s1060_s9 = smov 0   ;;  %s1062_s10 = smov 0  }
   0x2   :  { %s1064_s11 = smov 0   ;;  %s1066_s12 = smov 0  }
   0x3 LB: > { %s1081_s13 = sadd.s32 4294967295, %s1040_s12   ;;  %s764_s14 = sadd.s32 4294967294, %s1040_s12   ;;  %s1040_s12 = sphi %s1066_s12, %s1205_s12   ;;  %s1036_s11 = sphi %s1064_s11, %s1204_s11   ;;  %s1032_s10 = sphi %s1062_s10, %s1203_s10   ;;  %s1028_s9 = sphi %s1060_s9, %s1202_s9  }
   0x4   : > { %s1085_s15 = sadd.s32 1, %s1040_s12   ;;  %s69_s16 = sadd.s32 1, %s1036_s11 }
   0x5   : > { %s66_s17 = ssub.s32 %s1040_s12, %s1085_s15  ;;  %p79_p0 = scmp.ne.s32.totalorder %s1036_s11, %s1032_s10 }
   0x6   : > { %p67_p1 = scmp.eq.s32.totalorder %s66_s17, 0  ;;  %p80_p2 = scmp.eq.s32.totalorder %s1081_s13, 3 }
   0x7   : > { %p85_p3 = scmp.ne.s32.totalorder %s1032_s10, %s1028_s9  ;;  %p86_p4 = scmp.eq.s32.totalorder %s764_s14, 3 }
   0x8   : > { %s1096_s18 = scalar_select %p67_p1, %s1036_s11, %s69_s16  }
   0x9   : > { %p1098_p5 = por %p80_p2, %p79_p0  ;;  %p1102_p6 = por %p86_p4, %p85_p3 }
   0xa   : > { %p767_p7 = scmp.ge.s32.totalorder %s1040_s12, 1  ;;  %p116_p8 = scmp.lt.s32.totalorder %s1040_s12, 5 }
   0xc   : > { %p117_p9 = pnand %p767_p7, %p116_p8 }
   0xd   : > { %v147_v0 = vld [vmem:[%s1198_s1] sm:$0xff] (!%p117_p9)  ;;  %v148_v1 = vld [vmem:[%s1198_s1 + $0x8] sm:$0xff] (!%p117_p9)  ;;  %v149_v2 = vld [vmem:[%s1198_s1 + $0x10] sm:$0xff] (!%p117_p9)  ;;  %s769_s27 = sshll.u32 (!%p117_p9), %s1081_s13, 1  ;;  %vm151_vm0 = vcmask (!%p117_p9), 261120   ;;  %s135_s6 = sand.u32 (!%p117_p9), 1, %s1032_s10  }
   0xe   : > { %120 = sbr.rel (%p117_p9) target bundleno = 283 (0x11b), region = 28  ;;  %v159_v3 = vand.u32 (!%p117_p9), 4294901760, %v147_v0  ;;  %v162_v4 = vand.u32 (!%p117_p9), 4294901760, %v148_v1  ;;  %v150_v5 = vld [vmem:[%s1198_s1 + $0x18] sm:$0xff] (!%p117_p9)  ;;  %v165_v6 = vand.u32 (!%p117_p9), 4294901760, %v149_v2  ;;  %p139_p10 = scmp.lt.s32.totalorder (!%p117_p9), %s769_s27, 7 }
   0xf   : > { %v168_v7 = vand.u32 (!%p117_p9), 4294901760, %v150_v5  ;;  %s768_s7 = sshll.u32 (!%p117_p9), %s135_s6, 4  ;;  %s776_s16 = sshll.u32 (!%p117_p9), %s1081_s13, 8 }
  0x10   : > { %v1121_v8 = vpack.c.bf16 (!%p117_p9), %v162_v4, %v159_v3  ;;  %v249_v9 = vsub.f32 (!%p117_p9), %v147_v0, %v159_v3  ;;  %v256_v10 = vsub.f32 (!%p117_p9), %v148_v1, %v162_v4  ;;  %v1123_v11 = vsub.f32 (!%p117_p9), %v149_v2, %v165_v6  ;;  %s137_s8 = scalar_lea.vmem (!%p117_p9), [#allocation2], %s768_s7  ;;  %s1154_s22 = scalar_lea.hbm (!%p117_p9), %s1199_s2, %s776_s16 }
  0x11   : > { %v1125_v12 = vpack.c.bf16 (!%p117_p9), %v168_v7, %v165_v6  ;;  %v270_v13 = vsub.f32 (!%p117_p9), %v150_v5, %v168_v7  ;;  %s702_s14 = sshll.u32 (!%p117_p9), %s137_s8, 4  ;;  %s1156_s23 = scalar_lea.sflag (!%p117_p9), [#allocation3], %s135_s6  ;;  %s1149_s14 = int_to_ptr.vmem [resolvable:$true] %s702_s14 }
  0x12   : > { %904 = vmatprep.subr.bf16.mxu0 (!%p117_p9), %v1121_v8  ;;  %880 = vmatprep.subr.bf16.mxu1 (!%p117_p9), %v1121_v8  ;;  %v250_v14 = vand.u32 (!%p117_p9), 4294901760, %v249_v9  ;;  %v257_v15 = vand.u32 (!%p117_p9), 4294901760, %v256_v10  ;;  %v264_v16 = vand.u32 (!%p117_p9), 4294901760, %v1123_v11  ;;  %v895_v44 = vpack.c.bf16 (!%p117_p9), %v256_v10, %v249_v9  ;;  %s978_s24 = scalar_lea.vmem (!%p117_p9), %s1149_s14, 256  ;;  %s1042_s13 = smov (!%p117_p9), [#allocation2]  }
  0x13   : > { %906 = vmatpush3.bf16.msra.mxu0 (!%p117_p9), %v1121_v8  ;;  %882 = vmatpush3.bf16.msra.mxu1 (!%p117_p9), %v1121_v8  ;;  %v271_v17 = vand.u32 (!%p117_p9), 4294901760, %v270_v13  ;;  %v899_v45 = vpack.c.bf16 (!%p117_p9), %v270_v13, %v1123_v11  ;;  %p979_p11 = scmp.ne.s32.totalorder (!%p117_p9), %s1149_s14, %s978_s24  ;;  %s982_s25 = sshll.u32 (!%p117_p9), %s1042_s13, 4  ;;  %s983_s25 = int_to_ptr.vmem [resolvable:$false] %s982_s25 }
  0x14   : > { %908 = vmatprep.subr.bf16.mxu0 (!%p117_p9), %v1125_v12  ;;  %884 = vmatprep.subr.bf16.mxu1 (!%p117_p9), %v1125_v12  ;;  %v911_v20 = vpack.c.bf16 (!%p117_p9), %v257_v15, %v250_v14  ;;  %v251_v21 = vsub.f32 (!%p117_p9), %v249_v9, %v250_v14  ;;  %v258_v22 = vsub.f32 (!%p117_p9), %v256_v10, %v257_v15  ;;  %s984_s26 = scalar_lea.vmem (!%p117_p9), %s983_s25, 512  ;;  %p985_p0 = scmp.lt.s32.totalorder (!%p117_p9), %s1149_s14, %s983_s25 }
  0x15   : > { %s1207_s27 = smov (!%p139_p10, %s769_s27), 7  ;;  %v265_v29 = vsub.f32 %v1123_v11, %v264_v16  ;;  %v272_v30 = vsub.f32 %v270_v13, %v271_v17  ;;  %v915_v36 = vpack.c.bf16 %v271_v17, %v264_v16  ;;  %p980_p12 = pnand %p979_p11, %p1098_p5 }
  0x16   : > { %s770_s30 = sshll.u32 %s1207_s27, 3  ;;  %v252_v27 = vand.u32 4294901760, %v251_v21  ;;  %v259_v28 = vand.u32 4294901760, %v258_v22  ;;  %p986_p1 = scmp.lt.s32.totalorder %s984_s26, %s978_s24 }
  0x17   : > { %s142_s5 = scalar_lea.vmem %s1197_s0, %s770_s30  ;;  %910 = vmatpush3.bf16.msra.mxu0 %v1125_v12  ;;  %886 = vmatpush3.bf16.msra.mxu1 %v1125_v12  ;;  %v266_v37 = vand.u32 4294901760, %v265_v29  ;;  %v273_v38 = vand.u32 4294901760, %v272_v30  ;;  %p981_p13 = pneg %p980_p12 }
  0x18   : > { %v145_v18 = vld [vmem:[%s142_s5] sm:$0xff]  ;;  %v146_v19 = vld [vmem:[%s142_s5 + $0x8] sm:$0xff]  ;;  %912 = vmatprep.subr.bf16.mxu0 %v911_v20  ;;  %v887_v33 = vpack.c.bf16 %v259_v28, %v252_v27  ;;  %p987_p2 = por %p986_p1, %p985_p0 }
  0x19   : > { %v153_v23 = vsel %vm151_vm0, %v145_v18, 0  ;;  %v156_v24 = vsel %vm151_vm0, %v146_v19, 0  ;;  %v891_v43 = vpack.c.bf16 %v273_v38, %v266_v37 }
  0x1a   : > { %v227_v25 = vand.u32 4294901760, %v153_v23  ;;  %v237_v26 = vand.u32 4294901760, %v156_v24  ;;  %888 = vmatprep.subr.bf16.mxu1 %v887_v33  ;;  %p988_p3 = pnand %p987_p2, %p981_p13 }
  0x1c   : > { %v228_v31 = vsub.f32 %v153_v23, %v227_v25  ;;  %v238_v32 = vsub.f32 %v156_v24, %v237_v26 }
  0x1e   : > { %v229_v34 = vand.u32 4294901760, %v228_v31  ;;  %v239_v35 = vand.u32 4294901760, %v238_v32 }
  0x20   : > { %854 = vmatprep.mubr.f32.mxu0 %v229_v34  ;;  %v230_v39 = vsub.f32 %v228_v31, %v229_v34  ;;  %v240_v40 = vsub.f32 %v238_v32, %v239_v35 }
  0x21   : > { %855 = vmatmul.mubr.f32.vlgmr.msra.gmra.mrb[0].mxu0 %v239_v35 }
  0x22   : > { %914 = vmatpush3.bf16.msra.mxu0 %v911_v20  ;;  %v231_v41 = vand.u32 4294901760, %v230_v39  ;;  %v241_v42 = vand.u32 4294901760, %v240_v40  ;;  %865 = vmatprep.mubr.f32.mxu0 %v227_v25 }
  0x23   : > { %916 = vmatprep.subr.bf16.mxu0 %v915_v36 }
  0x24   : > { %821 = vmatprep.mubr.f32.mxu1 %v231_v41 }
  0x25   : > { %822 = vmatmul.mubr.f32.vlgmr.msra.gmra.mrb[0].mxu1 %v241_v42 }
  0x26   : > { %890 = vmatpush3.bf16.msra.mxu1 %v887_v33  ;;  %918 = vmatpush3.bf16.msra.mxu0 %v915_v36 }
  0x27   : > { %892 = vmatprep.subr.bf16.mxu1 %v891_v43  ;;  %920 = vmatprep.subr.bf16.mxu0 %v1121_v8 }
  0x28   : > { %832 = vmatprep.mubr.f32.mxu1 %v227_v25 }
  0x29   : > { %866 = vmatmul.mubr.f32.vlgmr.msra.gmra.mrb[0].mxu0 %v237_v26 }
  0x2a   : > { %894 = vmatpush3.bf16.msra.mxu1 %v891_v43  ;;  %922 = vmatpush3.bf16.msra.mxu0 %v1121_v8 }
  0x2b   : > { %896 = vmatprep.subr.bf16.mxu1 %v895_v44  ;;  %924 = vmatprep.subr.bf16.mxu0 %v1125_v12 }
  0x2c   : > { %876 = vmatprep.mubr.f32.mxu0 %v227_v25 }
  0x2d   : > { %833 = vmatmul.mubr.f32.vlgmr.msra.gmra.mrb[0].mxu1 %v237_v26 }
  0x2e   : > { %898 = vmatpush3.bf16.msra.mxu1 %v895_v44  ;;  %926 = vmatpush3.bf16.msra.mxu0 %v1125_v12 }
  0x2f   : > { %900 = vmatprep.subr.bf16.mxu1 %v899_v45  ;;  %843 = vmatprep.mubr.f32.mxu1 %v228_v31 }
  0x31   : > { %877 = vmatmul.mubr.f32.vlgmr.msra.gmra.mrb[0].mxu0 %v237_v26 }
  0x32   : > { %902 = vmatpush3.bf16.msra.mxu1 %v899_v45 }
  0x35   : > { %844 = vmatmul.mubr.f32.vlgmr.msra.gmra.mrb[0].mxu1 %v238_v32 }
 0x104   : > { %v878_v46 = vpop.f32.mrb[0].mxu0 }
 0x105   : > { %v676_v47 = vpop.f32.mrb[1].mxu0 }
 0x108   : > { %v845_v48 = vpop.f32.mrb[0].mxu1 }
 0x109   : > { %v927_v49 = vadd.f32 %v878_v46, %v845_v48  ;;  %v420_v50 = vpop.f32.mrb[1].mxu1 }
 0x10a   : > { %v928_v51 = vadd.f32 %v676_v47, %v420_v50 }
 0x10b   : > { %687 = vst [vmem:[%s137_s8 + $0x8] sm:$0xff] %v927_v49 }
 0x10c   : > { %686 = vst [vmem:[%s137_s8] sm:$0xff] %v928_v51 }
 0x10d   : > { %991 = shalt.err (!%p988_p3)
}
 0x10e   : > { %s992_s27 = scalar_lea.hbm %s1154_s22, 256  ;;  %s996_s30 = scalar_lea.hbm %s1199_s2, 1024 }
 0x10f   : > { %p993_p4 = scmp.ne.s32.totalorder %s1154_s22, %s992_s27  ;;  %p997_p9 = scmp.lt.u32.totalorder %s1154_s22, %s1199_s2 }
 0x110   : > { %p998_p10 = scmp.lt.u32.totalorder %s996_s30, %s992_s27  ;;  %p1000_p12 = scmp.lt.u32.totalorder %s992_s27, %s1154_s22 }
 0x111   : > { %p994_p7 = pnand %p993_p4, %p1098_p5 }
 0x112   : > { %p999_p11 = por %p998_p10, %p997_p9 }
 0x113   : > { %p995_p8 = pneg %p994_p7 }
 0x114   : > { %p1001_p13 = por %p1000_p12, %p999_p11 }
 0x116   : > { %p1002_p0 = pnand %p1001_p13, %p995_p8 }
 0x118   : > { %1005 = shalt.err (!%p1002_p0)
}
 0x119   : > { %s1043_s5 = smov 128   ;;  %s1044_s6 = smov 8  }
 0x11a   : > { %937 = dma.vmem_to_hbm [thread:$0]  (%p1098_p5), %s1149_s14, 256, %s1154_s22, %s1156_s23, %s1043_s5, %s1043_s5, %s1044_s6  }
 0x11b PF: > { %p943_p1 = scmp.ge.s32.totalorder %s1040_s12, 2  ;;  %s717_s7 = sand.u32 1, %s1028_s9  }
 0x11c   : > { %s718_s8 = scalar_lea.sflag [#allocation3], %s717_s7 }
 0x11d   : > { %p940_p2 = pnand %p943_p1, %p1102_p6 }
 0x11f   : > { %1023 = dma.done.wait (!%p940_p2), %s718_s8, 256  }
 0x120   : > { %1025 = vsyncadd (!%p940_p2), %s718_s8, 4294967040  ;;  %p12_p3 = scmp.ge.s32.totalorder %s1085_s15, 6   ;;  %s1202_s9 = smov %s1032_s10 }
 0x121   : > { %s1203_s10 = smov %s1036_s11  ;;  %s1204_s11 = smov %s1096_s18 }
 0x122   : > { %s1205_s12 = smov %s1085_s15  ;;  %14 = sbr.rel (!%p12_p3) target bundleno = 3 (0x3), region = 63 }
 0x129   :  { %723 = vsyncpa [#allocation3], 1 }
 0x12a   :  { %725 = vsyncpa [#allocation3 + $0x1], 1 }

</bundles_post_ra>
